<compile_context>
chip_gen: v7x
topology: tpu7x:2x2x1
jax: 0.10.0
libtpu: 0.0.40
codegen_flags: <defaults>
</compile_context>

<pallas_src>
import numpy as np
import jax
import jax.numpy as jnp
from jax.experimental import pallas as pl
from jax.experimental.pallas import tpu as pltpu

# ----------------------- synthetic cfg.* constants ---------------------------
PREPROC_MAX_SIZE = 256.0
MRCNN_HEAD_DIM = 8          # == FPN.NUM_CHANNEL (required by the reshape in forward)
FPN_NUM_CHANNEL = 8
FPN_FRCNN_FC_HEAD_DIM = 64
FPN_ANCHOR_STRIDES = (4, 8, 16, 32)
DATA_NUM_CLASS = 5
RPN_TEST_POST_NMS_TOPK = 16

# Packed lane-dense output slab layout ([N, 128] f32).
_NC = DATA_NUM_CLASS
COL_LOGITS = (0, _NC)                     # 0:5   label_logits
COL_BOX = (_NC, _NC + 4)                  # 5:9   box_logits
COL_COS = (_NC + 4, _NC + 5)              # 9:10  box_cos_logits
COL_SIN = (_NC + 5, _NC + 6)              # 10:11 box_sin_logits
COL_SCORES = (_NC + 6, 2 * _NC + 6)       # 11:16 label_scores
COL_DEC = (2 * _NC + 6, 2 * _NC + 10)     # 16:20 decoded + clipped proposals
OUT_WIDTH = 128                           # lane-dense slab width

K_REAL = FPN_NUM_CHANNEL * 7 * 7          # 392 : pooled-crop feature dim
K_PAD = ((K_REAL + 127) // 128) * 128     # 512 : lane-aligned contraction dim


# ----------------------------- Pallas kernel ---------------------------------
def _rcnn_head_kernel(x_ref, w6_ref, w7_ref, wh_ref, pvec_ref, prop_ref, out_ref):
    D = w7_ref.shape[0]

    # Packed small operands (one [4, 128] f32 VMEM tile).
    b6 = pvec_ref[0:1, 0:D]            # [1, 64]  fc6 bias
    b7 = pvec_ref[1:2, 0:D]            # [1, 64]  fc7 bias
    bh = pvec_ref[2:3, :]              # [1, 128] fused head bias (zeros past col 11)
    inv_rw = pvec_ref[3:4, 0:4]        # [1, 4]   1/reg_weights
    bounds = pvec_ref[3:4, 4:8]        # [1, 4]   (win0, win1, win0, win1) clip hi

    # fc6 / fc7 / fused heads: bf16 MXU operands, f32 accumulation, f32 VPU math.
    h = jnp.dot(x_ref[...], w6_ref[...], preferred_element_type=jnp.float32) + b6
    h = jnp.maximum(h, 0.0)
    h = jnp.dot(h.astype(jnp.bfloat16), w7_ref[...],
                preferred_element_type=jnp.float32) + b7
    h = jnp.maximum(h, 0.0)
    head = jnp.dot(h.astype(jnp.bfloat16), wh_ref[...],
                   preferred_element_type=jnp.float32) + bh        # [bn, 128]
    out_ref[...] = head                # one full-width, lane-dense (unmasked) store

    logits = head[:, COL_LOGITS[0]:COL_LOGITS[1]]
    box = head[:, COL_BOX[0]:COL_BOX[1]]

    # decoded_output_scores: softmax over classes (exact reciprocal; tiny).
    m = jnp.max(logits, axis=1, keepdims=True)
    e = jnp.exp(logits - m)
    scores = e * pl.reciprocal(jnp.sum(e, axis=1, keepdims=True), approx=False)

    # decode_output_boxes (class agnostic) + clip_boxes (reg_weights pre-inverted).
    t = box * inv_rw                              # [bn, 4] = (tx, ty, tw, th)
    p = prop_ref[...]                             # [bn, 4] = (x1, y1, x2, y2)
    xy1_a = p[:, 0:2]
    xy2_a = p[:, 2:4]
    wh_a = xy2_a - xy1_a
    ctr_a = (xy1_a + xy2_a) * 0.5
    clipc = jnp.float32(np.log(PREPROC_MAX_SIZE / 16.0))
    wh_b = jnp.exp(jnp.minimum(t[:, 2:4], clipc)) * wh_a
    ctr_b = t[:, 0:2] * wh_a + ctr_a
    dec = jnp.concatenate([ctr_b - 0.5 * wh_b, ctr_b + 0.5 * wh_b], axis=1)
    # clip_boxes, faithful to the reference: x clamped to window[0], y to window[1].
    dec = jnp.clip(dec, 0.0, bounds)

    # One merged masked tail store: cols 11:20 = (label_scores | decoded boxes).
    out_ref[:, COL_SCORES[0]:COL_DEC[1]] = jnp.concatenate([scores, dec], axis=1)


def rcnn_head_pallas(x, w6, w7, wh, pvec, proposals):
    N, Kp = x.shape
    D = w7.shape[0]
    # Row tiling: one block for small N; at production ROI counts use <=256-row
    # tiles with >=2 grid steps so both v7x TensorCores get work
    # (16-row multiple keeps bf16 sublane packing happy).
    if N <= 128:
        bn, Np = N, N
    else:
        bn = min(256, ((pl.cdiv(N, 2) + 15) // 16) * 16)
        Np = pl.cdiv(N, bn) * bn
    if Np != N:
        x = jnp.pad(x, ((0, Np - N), (0, 0)))
        proposals = jnp.pad(proposals, ((0, Np - N), (0, 0)))
    grid = (Np // bn,)

    slab = pl.pallas_call(
        _rcnn_head_kernel,
        out_shape=jax.ShapeDtypeStruct((Np, OUT_WIDTH), jnp.float32),
        grid=grid,
        in_specs=[
            pl.BlockSpec((bn, Kp), lambda i: (i, 0)),          # bf16 pooled roi crops
            pl.BlockSpec((Kp, D), lambda i: (0, 0)),           # bf16 fc6 weight (K-padded)
            pl.BlockSpec((D, D), lambda i: (0, 0)),            # bf16 fc7 weight
            pl.BlockSpec((D, OUT_WIDTH), lambda i: (0, 0)),    # bf16 fused head weight
            pl.BlockSpec((4, OUT_WIDTH), lambda i: (0, 0)),    # f32 packed biases/scalars
            pl.BlockSpec((bn, 4), lambda i: (i, 0)),           # f32 proposals
        ],
        out_specs=pl.BlockSpec((bn, OUT_WIDTH), lambda i: (i, 0)),
        compiler_params=pltpu.CompilerParams(dimension_semantics=("parallel",)),
    )(x, w6, w7, wh, pvec, proposals)
    return slab[:N]


# ------------- multilevel ROI align (gather-free XLA glue) -------------------
def multilevel_roi_align_v2_jax(rcnn_boxes, features, resolution, fold_pool=True):
    """torchvision roi_align semantics (aligned=True, sampling_ratio=1) with
    pad_border=True, expressed as interpolation-matrix matmuls (no gathers).
    Per-ROI level routing is folded into the interpolation matrix (no per-ROI
    replication of the feature pyramid). With fold_pool=True the module's
    2x2/stride-2 average pool is folded into Ry/Rx and the result is
    [N, C, resolution, resolution]; otherwise [N, C, 2*resolution, 2*resolution]."""
    # TODO(synk): move into the Pallas kernel with PrefetchScalarGridSpec
    # (roi_level / box offsets as scalar prefetch + manual per-level feature DMA)
    # to eliminate the [N, K] crop round-trip through HBM entirely.
    crop = resolution * 2
    x1, y1, x2, y2 = (rcnn_boxes[:, 0], rcnn_boxes[:, 1],
                      rcnn_boxes[:, 2], rcnn_boxes[:, 3])
    sqrtarea = jnp.sqrt((y2 - y1) * (x2 - x1))
    roi_level = 4.0 + jnp.log(sqrtarea * (1.0 / 224.0) + 1e-6) * (1.0 / np.log(2.0))
    roi_level = jnp.clip(roi_level.astype(jnp.int32), 2, 5)   # trunc like torch IntTensor
    onehot = jax.nn.one_hot(roi_level - 2, 4, dtype=jnp.float32)   # [N, 4]

    # Border-replicate pad each level, then zero-pad to a common [C, Hp, Wp].
    padded, hs, ws = [], [], []
    for i in range(4):
        f = features[i][0]                                    # [C, H, W]
        f = jnp.concatenate([f[:, :1, :], f, f[:, -1:, :]], axis=1)
        f = jnp.concatenate([f[:, :, :1], f, f[:, :, -1:]], axis=2)
        padded.append(f)
        hs.append(f.shape[1])
        ws.append(f.shape[2])
    Hp, Wp = max(hs), max(ws)
    featpad = jnp.stack(
        [jnp.pad(f, ((0, 0), (0, Hp - f.shape[1]), (0, Wp - f.shape[2]))) for f in padded])

    inv_strides = jnp.array([1.0 / s for s in FPN_ANCHOR_STRIDES], jnp.float32)
    sel_scale = onehot @ inv_strides                          # [N]
    sel_h = onehot @ jnp.array(hs, jnp.float32)               # padded H of selected level
    sel_w = onehot @ jnp.array(ws, jnp.float32)

    # Box coords in the selected level's (border-padded) frame: *1/stride then +1.
    bx1 = x1 * sel_scale + 1.0
    by1 = y1 * sel_scale + 1.0
    bx2 = x2 * sel_scale + 1.0
    by2 = y2 * sel_scale + 1.0

    m = jnp.arange(crop, dtype=jnp.float32)
    ys = (by1[:, None] - 0.5) + (m[None, :] + 0.5) * ((by2 - by1) / crop)[:, None]
    xs = (bx1[:, None] - 0.5) + (m[None, :] + 0.5) * ((bx2 - bx1) / crop)[:, None]

    def interp_matrix(c, size, extent):
        # c: [N, crop] sample coords; size: [N] valid (padded) extent; extent: static Hp/Wp
        sz = size[:, None]
        valid = (c >= -1.0) & (c <= sz)
        cc = jnp.maximum(c, 0.0)
        low = jnp.floor(cc)
        at_edge = low >= sz - 1.0
        low = jnp.minimum(low, sz - 1.0)
        cc = jnp.where(at_edge, sz - 1.0, cc)
        high = jnp.minimum(low + 1.0, sz - 1.0)
        frac = cc - low
        cols = jnp.arange(extent, dtype=jnp.float32)[None, None, :]
        r = ((cols == low[:, :, None]) * (1.0 - frac)[:, :, None]
             + (cols == high[:, :, None]) * frac[:, :, None])
        return r * valid[:, :, None].astype(jnp.float32)      # [N, crop, extent]

    Ry = interp_matrix(ys, sel_h, Hp)                          # [N, 14, Hp]
    Rx = interp_matrix(xs, sel_w, Wp)                          # [N, 14, Wp]
    if fold_pool:
        # Fold the 2x2/stride-2 average pool into the interpolation matrices.
        Ry = 0.5 * (Ry[:, 0::2, :] + Ry[:, 1::2, :])           # [N, 7, Hp]
        Rx = 0.5 * (Rx[:, 0::2, :] + Rx[:, 1::2, :])           # [N, 7, Wp]

    # Fold the per-ROI level one-hot into Ry (no sel_feat feature-map blow-up).
    Ryl = onehot[:, :, None, None] * Ry[:, None, :, :]         # [N, 4, p, Hp]
    tmp = jnp.einsum('nlih,lchw->nciw', Ryl, featpad)          # [N, C, p, Wp]
    return jnp.einsum('nciw,njw->ncij', tmp, Rx)               # [N, C, p, p]


# ----------------------------- parameter packing ------------------------------
def pack_params(params):
    """One-time host-side repack: lane-pad fc6 rows (392 -> 512), fuse the four
    heads into one [64, 128] weight, cast matmul operands to bf16 (biases f32)."""
    w6 = jnp.pad(params["w6"], ((0, K_PAD - K_REAL), (0, 0)))          # [512, 64]
    wh = jnp.concatenate([params["wc"], params["wb"], params["wcos"], params["wsin"]], axis=1)
    wh = jnp.pad(wh, ((0, 0), (0, OUT_WIDTH - wh.shape[1])))           # [64, 128]
    bh = jnp.concatenate([params["bc"], params["bb"], params["bcos"], params["bsin"]], axis=1)
    bh = jnp.pad(bh, ((0, 0), (0, OUT_WIDTH - bh.shape[1])))           # [1, 128] f32
    return dict(w6=w6.astype(jnp.bfloat16),
                w7=params["w7"].astype(jnp.bfloat16),
                wh=wh.astype(jnp.bfloat16),
                b6=params["b6"], b7=params["b7"], bh=bh)


def _make_pvec(packed, reg_weights, win):
    D = FPN_FRCNN_FC_HEAD_DIM
    pvec = jnp.zeros((4, OUT_WIDTH), jnp.float32)
    pvec = pvec.at[0, :D].set(packed["b6"].reshape(D))
    pvec = pvec.at[1, :D].set(packed["b7"].reshape(D))
    pvec = pvec.at[2, :].set(packed["bh"].reshape(OUT_WIDTH))
    pvec = pvec.at[3, 0:4].set(1.0 / reg_weights.reshape(4))
    pvec = pvec.at[3, 4:8].set(jnp.stack([win[0], win[1], win[0], win[1]]))
    return pvec


# ------------------------------- full forward --------------------------------
def rcnn_forward(image_shape2d, features, proposals, packed, reg_weights):
    N = proposals.shape[0]
    # Pooled ROI crop straight from the interp-matrix roi_align: [N, C, 7, 7].
    roi = multilevel_roi_align_v2_jax(proposals, features[:4], 7, fold_pool=True)
    x = roi.reshape(N, K_REAL)
    # Lane-align the contraction dim and narrow the big operand to bf16.
    x = jnp.pad(x, ((0, 0), (0, K_PAD - K_REAL))).astype(jnp.bfloat16)

    win = jnp.asarray(image_shape2d, jnp.float32)
    pvec = _make_pvec(packed, reg_weights, win)

    slab = rcnn_head_pallas(x, packed["w6"], packed["w7"], packed["wh"], pvec,
                            proposals.astype(jnp.float32))

    label_scores = slab[:, COL_SCORES[0]:COL_SCORES[1]]
    label_logits = slab[:, COL_LOGITS[0]:COL_LOGITS[1]]
    box_logits = slab[:, COL_BOX[0]:COL_BOX[1]]
    box_cos = slab[:, COL_COS[0]:COL_COS[1]]
    box_sin = slab[:, COL_SIN[0]:COL_SIN[1]]
    decoded = slab[:, COL_DEC[0]:COL_DEC[1]]
    return label_scores, label_logits, box_logits, box_cos, box_sin, decoded


# ------------------------ pure-JAX reference (for checking) -------------------
def _reference_head(roi14, params, proposals, reg_weights, image_shape2d):
    N = roi14.shape[0]
    pooled = roi14.reshape(N, FPN_NUM_CHANNEL, 7, 2, 7, 2).mean(axis=(3, 5))
    x = pooled.reshape(N, -1)
    h = jnp.maximum(x @ params["w6"] + params["b6"], 0.0)
    h = jnp.maximum(h @ params["w7"] + params["b7"], 0.0)
    logits = h @ params["wc"] + params["bc"]
    box = h @ params["wb"] + params["bb"]
    cos = h @ params["wcos"] + params["bcos"]
    sin = h @ params["wsin"] + params["bsin"]
    scores = jax.nn.softmax(logits, axis=1)
    t = box / reg_weights
    xy1_a, xy2_a = proposals[:, 0:2], proposals[:, 2:4]
    wh_a = xy2_a - xy1_a
    ctr_a = (xy1_a + xy2_a) * 0.5
    clipc = jnp.float32(np.log(PREPROC_MAX_SIZE / 16.0))
    wh_b = jnp.exp(jnp.minimum(t[:, 2:4], clipc)) * wh_a
    ctr_b = t[:, 0:2] * wh_a + ctr_a
    lo, hi = ctr_b - 0.5 * wh_b, ctr_b + 0.5 * wh_b
    win = jnp.asarray(image_shape2d, jnp.float32)
    dec = jnp.stack([jnp.clip(lo[:, 0], 0.0, win[0]), jnp.clip(lo[:, 1], 0.0, win[1]),
                     jnp.clip(hi[:, 0], 0.0, win[0]), jnp.clip(hi[:, 1], 0.0, win[1])], axis=1)
    return scores, logits, box, cos, sin, dec


def rcnn_reference_forward(image_shape2d, features, proposals, params, reg_weights):
    roi14 = multilevel_roi_align_v2_jax(proposals, features[:4], 7, fold_pool=False)
    return _reference_head(roi14, params, proposals, reg_weights, image_shape2d)


# ------------------------------ parameter init --------------------------------
def init_params(key):
    f_in = FPN_NUM_CHANNEL * 7 * 7      # = MRCNN.HEAD_DIM * 7 * 7
    d = FPN_FRCNN_FC_HEAD_DIM
    nc = DATA_NUM_CLASS
    ks = jax.random.split(key, 12)

    def w(k, shape, scale=0.02):
        return scale * jax.random.normal(k, shape, jnp.float32)

    return dict(
        w6=w(ks[0], (f_in, d)), b6=w(ks[1], (1, d)),
        w7=w(ks[2], (d, d)),    b7=w(ks[3], (1, d)),
        wc=w(ks[4], (d, nc)),   bc=w(ks[5], (1, nc)),
        wb=w(ks[6], (d, 4)),    bb=w(ks[7], (1, 4)),
        wcos=w(ks[8], (d, 1)),  bcos=w(ks[9], (1, 1)),
        wsin=w(ks[10], (d, 1)), bsin=w(ks[11], (1, 1)),
    )


# ----------------------------------- main -------------------------------------
if __name__ == "__main__":
    key = jax.random.PRNGKey(0)
    kf, kp, kb = jax.random.split(key, 3)

    params = init_params(kp)
    packed = pack_params(params)

    img_h, img_w = 64, 64
    image_shape2d = jnp.array([img_h, img_w], jnp.float32)

    # FPN features P2..P5, NCHW, strides (4, 8, 16, 32)
    sizes = [(16, 16), (8, 8), (4, 4), (2, 2)]
    fkeys = jax.random.split(kf, 4)
    features = [jax.random.normal(fkeys[i], (1, FPN_NUM_CHANNEL, s[0], s[1]), jnp.float32)
                for i, s in enumerate(sizes)]

    # Proposals: [TOPK, 4] boxes (x1, y1, x2, y2) inside the image
    N = RPN_TEST_POST_NMS_TOPK
    kb1, kb2 = jax.random.split(kb)
    xy1 = jax.random.uniform(kb1, (N, 2), minval=0.0, maxval=40.0)
    wh = jax.random.uniform(kb2, (N, 2), minval=4.0, maxval=24.0)
    xy2 = jnp.minimum(xy1 + wh, jnp.array([img_w - 1.0, img_h - 1.0]))
    proposals = jnp.concatenate([xy1, xy2], axis=1).astype(jnp.float32)

    reg_weights = jnp.array([[10.0, 10.0, 5.0, 5.0]], jnp.float32)

    fwd = jax.jit(rcnn_forward)
    outs = jax.block_until_ready(fwd(image_shape2d, features, proposals, packed, reg_weights))
    label_scores, label_logits, box_logits, box_cos, box_sin, dec = outs

    assert label_scores.shape == (N, DATA_NUM_CLASS)
    assert label_logits.shape == (N, DATA_NUM_CLASS)
    assert box_logits.shape == (N, 4)
    assert box_cos.shape == (N, 1) and box_sin.shape == (N, 1)
    assert dec.shape == (N, 4)
    assert bool(jnp.all(jnp.isfinite(label_scores)))

    # Correctness vs. a pure-JAX f32 reference of the module's head (14x14 crop
    # + avgpool + f32 FC stack). Pallas path uses bf16 matmul operands with f32
    # accumulation, so the tolerance is slightly looser than pure-f32.
    ref = jax.jit(rcnn_reference_forward)(image_shape2d, features, proposals,
                                          params, reg_weights)
    ref = jax.block_until_ready(ref)
    for got, want in zip(outs, ref):
        np.testing.assert_allclose(np.asarray(got), np.asarray(want),
                                   rtol=1e-2, atol=1e-2)

    print("KERNEL_OK")
</pallas_src>

<mosaic_0001>
module attributes {stable_mosaic.version = 11 : i64} {
  func.func @_rcnn_head_kernel(%arg0: i32, %arg1: memref<16x512xbf16, #tpu.memory_space<vmem>>, %arg2: memref<512x64xbf16, #tpu.memory_space<vmem>>, %arg3: memref<64x64xbf16, #tpu.memory_space<vmem>>, %arg4: memref<64x128xbf16, #tpu.memory_space<vmem>>, %arg5: memref<4x128xf32, #tpu.memory_space<vmem>>, %arg6: memref<16x4xf32, #tpu.memory_space<vmem>>, %arg7: memref<16x128xf32, #tpu.memory_space<vmem>>) attributes {dimension_semantics = [#tpu.dimension_semantics<parallel>], iteration_bounds = array<i64: 1>, scalar_prefetch = 0 : i64, scratch_operands = 0 : i64, tpu.core_type = #tpu.core_type<tc>, window_params = [{transform_indices = @transform_0, window_bounds = array<i64: 16, 512>}, {pipeline_mode = #tpu.pipeline_mode<synchronous>, transform_indices = @transform_1, window_bounds = array<i64: 512, 64>}, {pipeline_mode = #tpu.pipeline_mode<synchronous>, transform_indices = @transform_2, window_bounds = array<i64: 64, 64>}, {pipeline_mode = #tpu.pipeline_mode<synchronous>, transform_indices = @transform_3, window_bounds = array<i64: 64, 128>}, {pipeline_mode = #tpu.pipeline_mode<synchronous>, transform_indices = @transform_4, window_bounds = array<i64: 4, 128>}, {transform_indices = @transform_5, window_bounds = array<i64: 16, 4>}, {transform_indices = @transform_6, window_bounds = array<i64: 16, 128>}]} {
    %c0 = arith.constant 0 : index
    %c0_0 = arith.constant 0 : index
    %0 = vector.load %arg5[%c0, %c0_0] : memref<4x128xf32, #tpu.memory_space<vmem>>, vector<1x64xf32>
    %c1 = arith.constant 1 : index
    %c0_1 = arith.constant 0 : index
    %1 = vector.load %arg5[%c1, %c0_1] : memref<4x128xf32, #tpu.memory_space<vmem>>, vector<1x64xf32>
    %c2 = arith.constant 2 : index
    %c0_2 = arith.constant 0 : index
    %2 = vector.load %arg5[%c2, %c0_2] : memref<4x128xf32, #tpu.memory_space<vmem>>, vector<1x128xf32>
    %c3 = arith.constant 3 : index
    %c0_3 = arith.constant 0 : index
    %3 = vector.load %arg5[%c3, %c0_3] : memref<4x128xf32, #tpu.memory_space<vmem>>, vector<1x4xf32>
    %c3_4 = arith.constant 3 : index
    %c4 = arith.constant 4 : index
    %4 = vector.load %arg5[%c3_4, %c4] : memref<4x128xf32, #tpu.memory_space<vmem>>, vector<1x4xf32>
    %c0_5 = arith.constant 0 : index
    %c0_6 = arith.constant 0 : index
    %5 = vector.load %arg1[%c0_5, %c0_6] : memref<16x512xbf16, #tpu.memory_space<vmem>>, vector<16x512xbf16>
    %c0_7 = arith.constant 0 : index
    %c0_8 = arith.constant 0 : index
    %6 = vector.load %arg2[%c0_7, %c0_8] : memref<512x64xbf16, #tpu.memory_space<vmem>>, vector<512x64xbf16>
    %cst = arith.constant dense<0.000000e+00> : vector<16x64xf32>
    %7 = tpu.matmul %5, %6, %cst {dimension_numbers = #tpu.dot_dimension_numbers<[1], [0], [0], [1], [0, 0, 1, 1], [], []>} : vector<16x512xbf16>, vector<512x64xbf16>, vector<16x64xf32> -> vector<16x64xf32>
    %8 = vector.broadcast %0 : vector<1x64xf32> to vector<16x64xf32>
    %9 = arith.addf %7, %8 : vector<16x64xf32>
    %cst_9 = arith.constant 0.000000e+00 : f32
    %10 = vector.broadcast %cst_9 : f32 to vector<16x64xf32>
    %11 = arith.maximumf %9, %10 : vector<16x64xf32>
    %12 = arith.truncf %11 : vector<16x64xf32> to vector<16x64xbf16>
    %c0_10 = arith.constant 0 : index
    %c0_11 = arith.constant 0 : index
    %13 = vector.load %arg3[%c0_10, %c0_11] : memref<64x64xbf16, #tpu.memory_space<vmem>>, vector<64x64xbf16>
    %cst_12 = arith.constant dense<0.000000e+00> : vector<16x64xf32>
    %14 = tpu.matmul %12, %13, %cst_12 {dimension_numbers = #tpu.dot_dimension_numbers<[1], [0], [0], [1], [0, 0, 1, 1], [], []>} : vector<16x64xbf16>, vector<64x64xbf16>, vector<16x64xf32> -> vector<16x64xf32>
    %15 = vector.broadcast %1 : vector<1x64xf32> to vector<16x64xf32>
    %16 = arith.addf %14, %15 : vector<16x64xf32>
    %cst_13 = arith.constant 0.000000e+00 : f32
    %17 = vector.broadcast %cst_13 : f32 to vector<16x64xf32>
    %18 = arith.maximumf %16, %17 : vector<16x64xf32>
    %19 = arith.truncf %18 : vector<16x64xf32> to vector<16x64xbf16>
    %c0_14 = arith.constant 0 : index
    %c0_15 = arith.constant 0 : index
    %20 = vector.load %arg4[%c0_14, %c0_15] : memref<64x128xbf16, #tpu.memory_space<vmem>>, vector<64x128xbf16>
    %cst_16 = arith.constant dense<0.000000e+00> : vector<16x128xf32>
    %21 = tpu.matmul %19, %20, %cst_16 {dimension_numbers = #tpu.dot_dimension_numbers<[1], [0], [0], [1], [0, 0, 1, 1], [], []>} : vector<16x64xbf16>, vector<64x128xbf16>, vector<16x128xf32> -> vector<16x128xf32>
    %22 = vector.broadcast %2 : vector<1x128xf32> to vector<16x128xf32>
    %23 = arith.addf %21, %22 : vector<16x128xf32>
    %c0_17 = arith.constant 0 : index
    %c0_18 = arith.constant 0 : index
    %24 = vector.load %arg7[%c0_17, %c0_18] : memref<16x128xf32, #tpu.memory_space<vmem>>, vector<16x128xf32>
    tpu.vector_store %arg7[%c0_17, %c0_18], %23 {strides = array<i32>} : memref<16x128xf32, #tpu.memory_space<vmem>>, vector<16x128xf32>,
    %25 = vector.extract_strided_slice %23 {offsets = [0, 0], sizes = [16, 5], strides = [1, 1]} : vector<16x128xf32> to vector<16x5xf32>
    %26 = vector.extract_strided_slice %23 {offsets = [0, 5], sizes = [16, 4], strides = [1, 1]} : vector<16x128xf32> to vector<16x4xf32>
    %cst_19 = arith.constant dense<0xFF800000> : vector<16xf32>
    %27 = vector.multi_reduction <maximumf>, %25, %cst_19 [1] : vector<16x5xf32> to vector<16xf32>
    %28 = vector.shape_cast %27 : vector<16xf32> to vector<16x1xf32>
    %29 = vector.broadcast %28 : vector<16x1xf32> to vector<16x5xf32>
    %30 = arith.subf %25, %29 : vector<16x5xf32>
    %31 = math.exp %30 : vector<16x5xf32>
    %cst_20 = arith.constant dense<0.000000e+00> : vector<16xf32>
    %32 = vector.multi_reduction <add>, %31, %cst_20 [1] : vector<16x5xf32> to vector<16xf32>
    %33 = vector.shape_cast %32 : vector<16xf32> to vector<16x1xf32>
    %34 = tpu.reciprocal %33 : vector<16x1xf32> -> vector<16x1xf32>
    %35 = vector.broadcast %34 : vector<16x1xf32> to vector<16x5xf32>
    %36 = arith.mulf %31, %35 : vector<16x5xf32>
    %37 = vector.broadcast %3 : vector<1x4xf32> to vector<16x4xf32>
    %38 = arith.mulf %26, %37 : vector<16x4xf32>
    %c0_21 = arith.constant 0 : index
    %c0_22 = arith.constant 0 : index
    %39 = vector.load %arg6[%c0_21, %c0_22] : memref<16x4xf32, #tpu.memory_space<vmem>>, vector<16x4xf32>
    %40 = vector.extract_strided_slice %39 {offsets = [0, 0], sizes = [16, 2], strides = [1, 1]} : vector<16x4xf32> to vector<16x2xf32>
    %41 = vector.extract_strided_slice %39 {offsets = [0, 2], sizes = [16, 2], strides = [1, 1]} : vector<16x4xf32> to vector<16x2xf32>
    %42 = arith.subf %41, %40 : vector<16x2xf32>
    %43 = arith.addf %40, %41 : vector<16x2xf32>
    %cst_23 = arith.constant 5.000000e-01 : f32
    %44 = vector.broadcast %cst_23 : f32 to vector<16x2xf32>
    %45 = arith.mulf %43, %44 : vector<16x2xf32>
    %46 = vector.extract_strided_slice %38 {offsets = [0, 2], sizes = [16, 2], strides = [1, 1]} : vector<16x4xf32> to vector<16x2xf32>
    %cst_24 = arith.constant 2.77258873 : f32
    %47 = vector.broadcast %cst_24 : f32 to vector<16x2xf32>
    %48 = arith.minimumf %46, %47 : vector<16x2xf32>
    %49 = math.exp %48 : vector<16x2xf32>
    %50 = arith.mulf %49, %42 : vector<16x2xf32>
    %51 = vector.extract_strided_slice %38 {offsets = [0, 0], sizes = [16, 2], strides = [1, 1]} : vector<16x4xf32> to vector<16x2xf32>
    %52 = arith.mulf %51, %42 : vector<16x2xf32>
    %53 = arith.addf %52, %45 : vector<16x2xf32>
    %cst_25 = arith.constant 5.000000e-01 : f32
    %54 = vector.broadcast %cst_25 : f32 to vector<16x2xf32>
    %55 = arith.mulf %54, %50 : vector<16x2xf32>
    %56 = arith.subf %53, %55 : vector<16x2xf32>
    %cst_26 = arith.constant 5.000000e-01 : f32
    %57 = vector.broadcast %cst_26 : f32 to vector<16x2xf32>
    %58 = arith.mulf %57, %50 : vector<16x2xf32>
    %59 = arith.addf %53, %58 : vector<16x2xf32>
    %60 = tpu.concatenate %56, %59 in 1 : vector<16x2xf32>, vector<16x2xf32> -> vector<16x4xf32>
    %cst_27 = arith.constant 0.000000e+00 : f32
    %61 = vector.broadcast %cst_27 : f32 to vector<16x4xf32>
    %62 = arith.maximumf %61, %60 : vector<16x4xf32>
    %63 = vector.broadcast %4 : vector<1x4xf32> to vector<16x4xf32>
    %64 = arith.minimumf %63, %62 : vector<16x4xf32>
    %65 = tpu.concatenate %36, %64 in 1 : vector<16x5xf32>, vector<16x4xf32> -> vector<16x9xf32>
    %c0_28 = arith.constant 0 : index
    %c11 = arith.constant 11 : index
    %66 = vector.load %arg7[%c0_28, %c11] : memref<16x128xf32, #tpu.memory_space<vmem>>, vector<16x9xf32>
    tpu.vector_store %arg7[%c0_28, %c11], %65 {strides = array<i32>} : memref<16x128xf32, #tpu.memory_space<vmem>>, vector<16x9xf32>,
    return
  }
  func.func @transform_0(%arg0: i32) -> (i32, i32) {
    %c0_i32 = arith.constant 0 : i32
    %c0_i32_0 = arith.constant 0 : i32
    return %arg0, %c0_i32 : i32, i32
  }
  func.func @transform_1(%arg0: i32) -> (i32, i32) {
    %c0_i32 = arith.constant 0 : i32
    %c0_i32_0 = arith.constant 0 : i32
    %c0_i32_1 = arith.constant 0 : i32
    return %c0_i32, %c0_i32_0 : i32, i32
  }
  func.func @transform_2(%arg0: i32) -> (i32, i32) {
    %c0_i32 = arith.constant 0 : i32
    %c0_i32_0 = arith.constant 0 : i32
    %c0_i32_1 = arith.constant 0 : i32
    return %c0_i32, %c0_i32_0 : i32, i32
  }
  func.func @transform_3(%arg0: i32) -> (i32, i32) {
    %c0_i32 = arith.constant 0 : i32
    %c0_i32_0 = arith.constant 0 : i32
    %c0_i32_1 = arith.constant 0 : i32
    return %c0_i32, %c0_i32_0 : i32, i32
  }
  func.func @transform_4(%arg0: i32) -> (i32, i32) {
    %c0_i32 = arith.constant 0 : i32
    %c0_i32_0 = arith.constant 0 : i32
    %c0_i32_1 = arith.constant 0 : i32
    return %c0_i32, %c0_i32_0 : i32, i32
  }
  func.func @transform_5(%arg0: i32) -> (i32, i32) {
    %c0_i32 = arith.constant 0 : i32
    %c0_i32_0 = arith.constant 0 : i32
    return %arg0, %c0_i32 : i32, i32
  }
  func.func @transform_6(%arg0: i32) -> (i32, i32) {
    %c0_i32 = arith.constant 0 : i32
    %c0_i32_0 = arith.constant 0 : i32
    return %arg0, %c0_i32 : i32, i32
  }
}

</mosaic_0001>

<bundles_post_ra>
// kernel: rcnn_forward.1
= control target key start
LH: loop header
LB: loop body
LE: loop exit
PB: predicated region body
PF: predicated region fallthrough
CT: control target
= control target key end

     0   :  { %v919_v34 = vmov 0.0   ;;  %vm920_vm0 = vmmov 0   ;;  %s922_s9 = smov 2   ;;  %s923_s14 = smov 126   ;;  %vm433_vm1 = vcmask 523264   ;;  %vm563_vm2 = vcmask 39936   ;;  %s1165_s1 = inlined_call_operand.vmem [shape: bf16[512,64], index: 1, kind: input, shape index: {}]   ;;  %s1166_s0 = inlined_call_operand.vmem [shape: bf16[16,512], index: 0, kind: input, shape index: {}]   ;;  %s1167_s2 = inlined_call_operand.vmem [shape: bf16[64,64], index: 2, kind: input, shape index: {}]   ;;  %s1168_s4 = inlined_call_operand.vmem [shape: f32[4,128], index: 4, kind: input, shape index: {}]   ;;  %s1169_s5 = inlined_call_operand.vmem [shape: f32[16,4], index: 5, kind: input, shape index: {}]   ;;  %s1170_s3 = inlined_call_operand.vmem [shape: bf16[64,128], index: 3, kind: input, shape index: {}]   ;;  %s1171_s6 = inlined_call_operand.vmem [shape: f32[16,128], index: 6, kind: output, shape index: {}]  }
   0x1   :  { %v861_v0 = vld [vmem:[%s1165_s1 + $0x40] sm:$0xff]   ;;  %v865_v4 = vld [vmem:[%s1165_s1 + $0x48] sm:$0xff]   ;;  %v869_v8 = vld [vmem:[%s1165_s1 + $0x50] sm:$0xff]   ;;  %s924_s20 = smov 3   ;;  %s926_s26 = smov 125   ;;  %vm682_vm3 = vcmask 15360  }
   0x2   :  { %v862_v1 = vld [vmem:[%s1165_s1 + $0xc0] sm:$0xff]   ;;  %772 = vmatprep.subr.bf16.mxu0 %v861_v0  ;;  %v866_v5 = vld [vmem:[%s1165_s1 + $0xc8] sm:$0xff]   ;;  %v870_v9 = vld [vmem:[%s1165_s1 + $0xd0] sm:$0xff]   ;;  %s927_s27 = smov 4   ;;  %s928_s28 = smov 1   ;;  %vm715_vm4 = vcmask 162904  }
   0x3   :  { %v863_v2 = vld [vmem:[%s1165_s1] sm:$0xff]   ;;  %794 = vmatprep.subr.bf16.mxu1 %v862_v1  ;;  %v867_v6 = vld [vmem:[%s1165_s1 + $0x8] sm:$0xff]   ;;  %v871_v10 = vld [vmem:[%s1165_s1 + $0x10] sm:$0xff]   ;;  %s929_s29 = smov 11  }
   0x4   :  { %v864_v3 = vld [vmem:[%s1165_s1 + $0x80] sm:$0xff]   ;;  %773 = vmatpush3.bf16.msra.mxu0 %v863_v2  ;;  %v868_v7 = vld [vmem:[%s1165_s1 + $0x88] sm:$0xff]   ;;  %v872_v11 = vld [vmem:[%s1165_s1 + $0x90] sm:$0xff]  }
   0x5   :  { %795 = vmatpush3.bf16.msra.mxu1 %v864_v3  ;;  %774 = vmatprep.subr.bf16.mxu0 %v865_v4  ;;  %v873_v12 = vld [vmem:[%s1165_s1 + $0x58] sm:$0xff]   ;;  %v877_v16 = vld [vmem:[%s1165_s1 + $0x60] sm:$0xff]   ;;  %v881_v20 = vld [vmem:[%s1165_s1 + $0x68] sm:$0xff]  }
   0x6   :  { %796 = vmatprep.subr.bf16.mxu1 %v866_v5  ;;  %v874_v13 = vld [vmem:[%s1165_s1 + $0xd8] sm:$0xff]   ;;  %v878_v17 = vld [vmem:[%s1165_s1 + $0xe0] sm:$0xff]   ;;  %v882_v21 = vld [vmem:[%s1165_s1 + $0xe8] sm:$0xff]  }
   0x7   :  { %v875_v14 = vld [vmem:[%s1165_s1 + $0x18] sm:$0xff]   ;;  %v879_v18 = vld [vmem:[%s1165_s1 + $0x20] sm:$0xff]   ;;  %v883_v22 = vld [vmem:[%s1165_s1 + $0x28] sm:$0xff]  }
   0x8   :  { %775 = vmatpush3.bf16.msra.mxu0 %v867_v6  ;;  %v876_v15 = vld [vmem:[%s1165_s1 + $0x98] sm:$0xff]   ;;  %v880_v19 = vld [vmem:[%s1165_s1 + $0xa0] sm:$0xff]   ;;  %v884_v23 = vld [vmem:[%s1165_s1 + $0xa8] sm:$0xff]  }
   0x9   :  { %797 = vmatpush3.bf16.msra.mxu1 %v868_v7  ;;  %776 = vmatprep.subr.bf16.mxu0 %v869_v8  ;;  %v885_v24 = vld [vmem:[%s1165_s1 + $0x70] sm:$0xff]   ;;  %v889_v28 = vld [vmem:[%s1165_s1 + $0x78] sm:$0xff]   ;;  %v899_v37 = vld [vmem:[%s1167_s2] sm:$0xff]  }
   0xa   :  { %798 = vmatprep.subr.bf16.mxu1 %v870_v9  ;;  %v886_v25 = vld [vmem:[%s1165_s1 + $0xf0] sm:$0xff]   ;;  %v890_v29 = vld [vmem:[%s1165_s1 + $0xf8] sm:$0xff]   ;;  %v900_v38 = vld [vmem:[%s1167_s2 + $0x8] sm:$0xff]  }
   0xb   :  { %v887_v26 = vld [vmem:[%s1165_s1 + $0x30] sm:$0xff]   ;;  %v891_v30 = vld [vmem:[%s1165_s1 + $0x38] sm:$0xff]   ;;  %v1095_v41 = vld [vmem:[%s1168_s4 + $0x3] ss:$0 sm:$0xff] }
   0xc   :  { %777 = vmatpush3.bf16.msra.mxu0 %v871_v10  ;;  %v888_v27 = vld [vmem:[%s1165_s1 + $0xb0] sm:$0xff]   ;;  %v892_v31 = vld [vmem:[%s1165_s1 + $0xb8] sm:$0xff]   ;;  %v596_v42 = vld [vmem:[%s1169_s5] sm:$0xff] }
   0xd   :  { %799 = vmatpush3.bf16.msra.mxu1 %v872_v11  ;;  %778 = vmatprep.subr.bf16.mxu0 %v873_v12  ;;  %v893_v32 = vld [vmem:[%s1166_s0] ss:$16 sps:$4 sm:$0xff]   ;;  %v895_v33 = vld [vmem:[%s1166_s0 + $0x4] ss:$16 sps:$4 sm:$0xff]   ;;  %v896_v35 = vld [vmem:[%s1166_s0 + $0x8] ss:$16 sps:$4 sm:$0xff]  }
   0xe   :  { %800 = vmatprep.subr.bf16.mxu1 %v874_v13  ;;  %v898_v36 = vld [vmem:[%s1166_s0 + $0xc] ss:$16 sps:$4 sm:$0xff]   ;;  %344 = vmatprep.mubr.bf16.mxu0 %v895_v33  ;;  %v901_v39 = vld [vmem:[%s1167_s2 + $0x10] sm:$0xff]   ;;  %v903_v44 = vld [vmem:[%s1170_s3] sm:$0xff]  }
   0xf   :  { %385 = vmatprep.mubr.bf16.mxu1 %v898_v36  ;;  %v902_v40 = vld [vmem:[%s1167_s2 + $0x18] sm:$0xff]   ;;  %v597_v43 = vld [vmem:[%s1169_s5 + $0x8] sm:$0xff]  ;;  %s921_s2 = smov 5   ;;  %600 = vrot.lane.b32.xlu0 %v596_v42, %s922_s9  ;;  %v722_v48 = vld [vmem:[%s1168_s4] ss:$0 sm:$0xff] }
  0x10   :  { %779 = vmatpush3.bf16.msra.mxu0 %v875_v14  ;;  %591 = vrot.lane.b32.xlu1 %v1095_v41, %s921_s2  ;;  %v904_v45 = vld [vmem:[%s1170_s3 + $0x8] sm:$0xff]   ;;  %v905_v2 = vld [vmem:[%s1170_s3 + $0x10] sm:$0xff]   ;;  %v906_v3 = vld [vmem:[%s1170_s3 + $0x18] sm:$0xff]  }
  0x11   :  { %801 = vmatpush3.bf16.msra.mxu1 %v876_v15  ;;  %780 = vmatprep.subr.bf16.mxu0 %v877_v16  ;;  %v759_v15 = vld [vmem:[%s1168_s4 + $0x1] ss:$0 sm:$0xff] }
  0x12   :  { %802 = vmatprep.subr.bf16.mxu1 %v878_v17 }
  0x13   :  { %602 = vrot.lane.b32.xlu0 %v597_v43, %s922_s9 }
  0x14   :  { %781 = vmatpush3.bf16.msra.mxu0 %v879_v18  ;;  %608 = vrot.lane.b32.xlu1 %v596_v42, %s923_s14 }
  0x15   :  { %803 = vmatpush3.bf16.msra.mxu1 %v880_v19  ;;  %782 = vmatprep.subr.bf16.mxu0 %v881_v20 }
  0x16   :  { %804 = vmatprep.subr.bf16.mxu1 %v882_v21 }
  0x17   :  { %610 = vrot.lane.b32.xlu0 %v597_v43, %s923_s14 }
  0x18   :  { %783 = vmatpush3.bf16.msra.mxu0 %v883_v22 }
  0x19   :  { %805 = vmatpush3.bf16.msra.mxu1 %v884_v23  ;;  %784 = vmatprep.subr.bf16.mxu0 %v885_v24 }
  0x1a   :  { %806 = vmatprep.subr.bf16.mxu1 %v886_v25  ;;  %v765_v25 = vld [vmem:[%s1168_s4 + $0x2] ss:$0 sm:$0xff]  ;;  %s925_s4 = smov 123  }
  0x1c   :  { %785 = vmatpush3.bf16.msra.mxu0 %v887_v26 }
  0x1d   :  { %807 = vmatpush3.bf16.msra.mxu1 %v888_v27  ;;  %786 = vmatprep.subr.bf16.mxu0 %v889_v28 }
  0x1e   :  { %808 = vmatprep.subr.bf16.mxu1 %v890_v29 }
  0x20   :  { %787 = vmatpush3.bf16.msra.mxu0 %v891_v30 }
  0x21   :  { %809 = vmatpush3.bf16.msra.mxu1 %v892_v31  ;;  %826 = vmatprep.subr.bf16.mxu0 %v919_v34 }
  0x22   :  { %838 = vmatprep.subr.bf16.mxu1 %v919_v34 }
  0x23   :  { %345 = vmatmul.mubr.bf16.vlgmr.msra.gmra.mrb[0].mxu0 %v893_v32 }
  0x24   :  { %386 = vmatmul.mubr.bf16.vlgmr.msra.gmra.mrb[0].mxu1 %v896_v35  ;;  %827 = vmatpush3.bf16.msra.mxu0 %v899_v37 }
  0x25   :  { %828 = vmatprep.subr.bf16.mxu0 %v919_v34  ;;  %834 = vmatprep.mubr.msk.bf16.mxu0 %vm920_vm0, %v919_v34 }
  0x26   :  { %846 = vmatprep.mubr.msk.bf16.mxu1 %vm920_vm0, %v919_v34  ;;  %839 = vmatpush3.bf16.msra.mxu1 %v903_v44 }
  0x27   :  { %840 = vmatprep.subr.bf16.mxu1 %v919_v34 }
  0x28   :  { %829 = vmatpush3.bf16.msra.mxu0 %v900_v38 }
  0x29   :  { %830 = vmatprep.subr.bf16.mxu0 %v919_v34 }
  0x2a   :  { %841 = vmatpush3.bf16.msra.mxu1 %v904_v45 }
  0x2b   :  { %842 = vmatprep.subr.bf16.mxu1 %v919_v34 }
  0x2c   :  { %831 = vmatpush3.bf16.msra.mxu0 %v901_v39 }
  0x2d   :  { %832 = vmatprep.subr.bf16.mxu0 %v919_v34 }
  0x2e   :  { %843 = vmatpush3.bf16.msra.mxu1 %v905_v2 }
  0x2f   :  { %844 = vmatprep.subr.bf16.mxu1 %v919_v34 }
  0x30   :  { %833 = vmatpush3.bf16.msra.mxu0 %v902_v40 }
  0x32   :  { %845 = vmatpush3.bf16.msra.mxu1 %v906_v3 }
  0x81   :  { %v601_v4 = vpop.permute.xlu0 %600 }
  0x82   :  { %v592_v5 = vpop.permute.xlu1 %591  ;;  %v606_v6 = vsub.f32 %v596_v42, %v601_v4 }
  0x84   :  { %626 = vrot.lane.b32.xlu1 %v606_v6, %s921_s2 }
  0x85   :  { %v603_v7 = vpop.permute.xlu0 %602 }
  0x86   :  { %v609_v8 = vpop.permute.xlu1 %608  ;;  %v607_v9 = vsub.f32 %v597_v43, %v603_v7 }
  0x87   :  { %v614_v10 = vadd.f32 %v609_v8, %v596_v42 }
  0x88   :  { %628 = vrot.lane.b32.xlu0 %v607_v9, %s921_s2  ;;  %634 = vrot.lane.b32.xlu1 %v606_v6, %s924_s20 }
  0x89   :  { %v616_v11 = vmul.f32 0.5, %v614_v10  ;;  %v611_v12 = vpop.permute.xlu0 %610 }
  0x8a   :  { %v615_v13 = vadd.f32 %v611_v12, %v597_v43 }
  0x8c   :  { %v617_v14 = vmul.f32 0.5, %v615_v13  ;;  %636 = vrot.lane.b32.xlu0 %v607_v9, %s924_s20  ;;  %644 = vrot.lane.b32.xlu1 %v616_v11, %s921_s2 }
  0x90   :  { %646 = vrot.lane.b32.xlu0 %v617_v14, %s921_s2 }
  0xf6   :  { %v788_v46 = vpop.f32.mrb[0].mxu0  ;;  %v627_v39 = vpop.permute.xlu1 %626 }
  0xf7   :  { %v810_v47 = vpop.f32.mrb[0].mxu1  ;;  %v789_v49 = vpop.f32.mrb[1].mxu0 }
  0xf8   :  { %v790_v50 = vadd.f32 %v789_v49, %v788_v46  ;;  %v811_v51 = vpop.f32.mrb[1].mxu1  ;;  %v791_v52 = vpop.f32.mrb[2].mxu0 }
  0xf9   :  { %v812_v53 = vadd.f32 %v811_v51, %v810_v47  ;;  %v813_v54 = vpop.f32.mrb[2].mxu1  ;;  %v792_v55 = vpop.f32.mrb[3].mxu0 }
  0xfa   :  { %v347_v56 = vadd.f32 %v790_v50, %v722_v48  ;;  %v793_v57 = vadd.f32 %v792_v55, %v791_v52  ;;  %v814_v58 = vpop.f32.mrb[3].mxu1  ;;  %v629_v43 = vpop.permute.xlu0 %628 }
  0xfb   :  { %v815_v59 = vadd.f32 %v814_v58, %v813_v54  ;;  %v635_v47 = vpop.permute.xlu1 %634 }
  0xfc   :  { %v388_v60 = vadd.f32 %v812_v53, %v347_v56  ;;  %v350_v61 = vadd.f32 %v793_v57, %v722_v48 }
  0xfe   :  { %v391_v62 = vadd.f32 %v815_v59, %v350_v61  ;;  %v394_v63 = vmax.f32 %v388_v60, 0.0  ;;  %v637_v48 = vpop.permute.xlu0 %636 }
  0xff   :  { %v645_v50 = vpop.permute.xlu1 %644 }
 0x100   :  { %v395_v0 = vmax.f32 %v391_v62, 0.0 }
 0x102   :  { %v396_v1 = vpack.c.bf16 %v395_v0, %v394_v63  ;;  %v647_v52 = vpop.permute.xlu0 %646 }
 0x104   :  { %835 = vmatmul.mubr.msk.bf16.vlgmr.msra.gmra.mrb[4].mxu0 %vm433_vm1, %v396_v1 }
 0x1d7   :  { %v471_v16 = vpop.f32.mrb[4].mxu0 }
 0x1d8   :  { %v472_v17 = vadd.f32 %v759_v15, %v471_v16  ;;  %v836_v18 = vpop.f32.mrb[5].mxu0 }
 0x1d9   :  { %v474_v19 = vpop.f32.mrb[6].mxu0 }
 0x1da   :  { %v475_v20 = vadd.f32 %v759_v15, %v474_v19  ;;  %v837_v21 = vpop.f32.mrb[7].mxu0  ;;  %v478_v22 = vmax.f32 %v472_v17, 0.0 }
 0x1dc   :  { %v479_v23 = vmax.f32 %v475_v20, 0.0 }
 0x1de   :  { %v480_v24 = vpack.c.bf16 %v479_v23, %v478_v22 }
 0x1e0   :  { %847 = vmatmul.mubr.msk.bf16.vlgmr.msra.gmra.mrb[4].mxu1 %vm433_vm1, %v480_v24 }
 0x2b3   :  { %v554_v26 = vpop.f32.mrb[4].mxu1 }
 0x2b4   :  { %v1137_v27 = vadd.f32 %v765_v25, %v554_v26  ;;  %v848_v28 = vpop.f32.mrb[5].mxu1 }
 0x2b5   :  { %v557_v29 = vpop.f32.mrb[6].mxu1 }
 0x2b6   :  { %v594_v30 = vmul.f32 %v592_v5, %v1137_v27  ;;  %v558_v31 = vadd.f32 %v765_v25, %v557_v29  ;;  %v849_v32 = vpop.f32.mrb[7].mxu1  ;;  %561 = vst [vmem:[%s1171_s6] sm:$0xff] %v1137_v27  ;;  %v564_v62 = vsel %vm563_vm2, %v1137_v27, -inf }
 0x2b8   :  { %v618_v33 = vmin.f32 %v594_v30, 2.7725887  ;;  %v595_v34 = vmul.f32 %v592_v5, %v558_v31  ;;  %562 = vst [vmem:[%s1171_s6 + $0x8] sm:$0xff] %v558_v31  ;;  %v640_v49 = vmul.f32 %v635_v47, %v594_v30  ;;  %v567_v61 = vsel %vm563_vm2, %v558_v31, -inf }
 0x2ba   :  { %v620_v35 = vmul.f32 1.442695, %v618_v33  ;;  %v619_v36 = vmin.f32 %v595_v34, 2.7725887  ;;  %v641_v51 = vmul.f32 %v637_v48, %v595_v34  ;;  %v650_v53 = vadd.f32 %v645_v50, %v640_v49 }
 0x2bc   :  { %907 = vpow2.f32 %v620_v35  ;;  %v622_v37 = vmul.f32 1.442695, %v619_v36  ;;  %v651_v55 = vadd.f32 %v647_v52, %v641_v51 }
 0x2be   :  { %909 = vpow2.f32 %v622_v37 }
 0x2c6   :  { %v908_v38 = vpop.eup %907 }
 0x2c7   :  { %v632_v40 = vmul.f32 %v908_v38, %v627_v39 }
 0x2c8   :  { %v910_v42 = vpop.eup %909 }
 0x2c9   :  { %v652_v44 = vmul.f32 0.5, %v632_v40  ;;  %v633_v45 = vmul.f32 %v910_v42, %v629_v43 }
 0x2cb   :  { %656 = vrot.lane.b32.xlu1 %v652_v44, %s923_s14  ;;  %v653_v46 = vmul.f32 0.5, %v633_v45 }
 0x2cd   :  { %658 = vrot.lane.b32.xlu0 %v653_v46, %s923_s14 }
 0x33d   :  { %v657_v54 = vpop.permute.xlu1 %656 }
 0x33e   :  { %v662_v56 = vsub.f32 %v650_v53, %v657_v54  ;;  %v664_v59 = vadd.f32 %v657_v54, %v650_v53 }
 0x33f   :  { %v659_v57 = vpop.permute.xlu0 %658 }
 0x340   :  { %v663_v58 = vsub.f32 %v651_v55, %v659_v57  ;;  %668 = vrot.lane.b32.xlu1 %v662_v56, %s925_s4  ;;  %v665_v60 = vadd.f32 %v659_v57, %v651_v55 }
 0x342   :  { %670 = vrot.lane.b32.xlu0 %v663_v58, %s925_s4 }
 0x344   :  { %676 = vrot.lane.b32.xlu1 %v664_v59, %s926_s26 }
 0x346   :  { %678 = vrot.lane.b32.xlu0 %v665_v60, %s926_s26 }
 0x365   :  { %568 = vmax.xlane.f32.xlu0 %v567_v61 }
 0x368   :  { %565 = vmax.xlane.f32.xlu1 %v564_v62 }
 0x3b2   :  { %v669_v63 = vpop.permute.xlu1 %668 }
 0x3b4   :  { %v671_v0 = vpop.permute.xlu0 %670 }
 0x3b6   :  { %v677_v1 = vpop.permute.xlu1 %676 }
 0x3b7   :  { %v683_v2 = vsel %vm682_vm3, %v669_v63, %v677_v1 }
 0x3b8   :  { %v685_v3 = vmax.f32 %v683_v2, 0.0  ;;  %v679_v4 = vpop.permute.xlu0 %678 }
 0x3b9   :  { %v684_v5 = vsel %vm682_vm3, %v671_v0, %v679_v4 }
 0x3ba   :  { %v686_v6 = vmax.f32 %v684_v5, 0.0  ;;  %689 = vrot.lane.b32.xlu0 %v685_v3, %s927_s27 }
 0x3bc   :  { %691 = vrot.lane.b32.xlu1 %v686_v6, %s927_s27 }
 0x3f2   :  { %v569_v7 = vpop.xlane.xlu0 %568 }
 0x3f3   :  { %v571_v8 = vsub.f32 %v558_v31, %v569_v7 }
 0x3f5   :  { %v574_v9 = vmul.f32 1.442695, %v571_v8  ;;  %v566_v10 = vpop.xlane.xlu1 %565 }
 0x3f6   :  { %v570_v11 = vsub.f32 %v1137_v27, %v566_v10 }
 0x3f7   :  { %911 = vpow2.f32 %v574_v9 }
 0x3f8   :  { %v572_v12 = vmul.f32 1.442695, %v570_v11 }
 0x3fa   :  { %913 = vpow2.f32 %v572_v12 }
 0x401   :  { %v912_v13 = vpop.eup %911 }
 0x402   :  { %v579_v14 = vsel %vm563_vm2, %v912_v13, 0.0 }
 0x403   :  { %580 = vadd.xlane.f32.xlu0 %v579_v14 }
 0x404   :  { %v914_v15 = vpop.eup %913 }
 0x405   :  { %v576_v16 = vsel %vm563_vm2, %v914_v15, 0.0 }
 0x406   :  { %577 = vadd.xlane.f32.xlu1 %v576_v16 }
 0x42c   :  { %v690_v17 = vpop.permute.xlu0 %689 }
 0x42d   :  { %v695_v18 = vmin.f32 %v1095_v41, %v690_v17 }
 0x42e   :  { %v692_v19 = vpop.permute.xlu1 %691 }
 0x42f   :  { %v696_v20 = vmin.f32 %v1095_v41, %v692_v19  ;;  %699 = vrot.lane.b32.xlu0 %v695_v18, %s928_s28 }
 0x431   :  { %701 = vrot.lane.b32.xlu1 %v696_v20, %s928_s28 }
 0x490   :  { %v581_v21 = vpop.xlane.xlu0 %580 }
 0x493   :  { %v578_v22 = vpop.xlane.xlu1 %577 }
 0x494   :  { %915 = vrcp.f32 %v578_v22 }
 0x495   :  { %917 = vrcp.f32 %v581_v21 }
 0x49e   :  { %v916_v23 = vpop.eup %915 }
 0x49f   :  { %v918_v24 = vpop.eup %917  ;;  %v584_v25 = vmul.f32 %v916_v23, %v914_v15 }
 0x4a0   :  { %v585_v28 = vmul.f32 %v918_v24, %v912_v13 }
 0x4a1   :  { %v700_v26 = vpop.permute.xlu0 %699 }
 0x4a2   :  { %v705_v27 = vsel %vm563_vm2, %v584_v25, %v700_v26 }
 0x4a3   :  { %v702_v29 = vpop.permute.xlu1 %701  ;;  %709 = vrot.lane.b32.xlu1 %v705_v27, %s929_s29 }
 0x4a4   :  { %v706_v30 = vsel %vm563_vm2, %v585_v28, %v702_v29 }
 0x4a5   :  { %711 = vrot.lane.b32.xlu0 %v706_v30, %s929_s29 }
 0x515   :  { %v710_v41 = vpop.permute.xlu1 %709 }
 0x516   :  { %716 = vst.msk [vmem:[%s1171_s6] sm:$0xff] %vm715_vm4, %v710_v41 }
 0x517   :  { %v712_v31 = vpop.permute.xlu0 %711 }
 0x518   :  { %717 = vst.msk [vmem:[%s1171_s6 + $0x8] sm:$0xff] %vm715_vm4, %v712_v31 }

</bundles_post_ra>
